<compile_context>
chip_gen: v7x
topology: tpu7x:2x2x1
jax: 0.10.0
libtpu: 0.0.40
codegen_flags: <defaults>
</compile_context>

<pallas_src>
import functools

import jax
import jax.numpy as jnp
from jax import lax
from jax.experimental import pallas as pl
from jax.experimental.pallas import tpu as pltpu


def attention_kernel(x_ref, w_ref, b_ref, o_ref, *, l_true):
    # x_ref : (TB, Lp, D)   batch-block of inputs (Lp = L padded to 8-granule)
    # w_ref : (Hp, D)       fc1 weight (PyTorch layout), VMEM-resident
    # b_ref : (1, Hp)       fc1 bias row, VMEM-resident
    # o_ref : (TB, Hp, Lp)  output block, L lane-major
    tb, lp, d = x_ref.shape
    hp = w_ref.shape[0]

    # ---- one fused matmul per grid step ------------------------------------
    # (TB*Lp, D) contracted with (Hp, D): x streams as the MXU LHS, the
    # resident weight is the RHS; bias is broadcast/added exactly once.
    x_flat = x_ref[...].reshape(tb * lp, d)             # free relayout (Lp % 8 == 0)
    logits = lax.dot_general(
        x_flat, w_ref[...], (((1,), (1,)), ((), ())),
        preferred_element_type=jnp.float32,
    ) + b_ref[...]                                       # (TB*Lp, Hp)
    logits = logits.reshape(tb, lp, hp)                  # free split of leading dim

    # ---- per batch element: XLU transpose + lane-axis softmax + store ------
    for t in range(tb):                                   # tiny static loop: no matmuls,
        lt = logits[t].T                                   # (Hp, Lp) 2-D transpose
        if lp != l_true:                                   # mask padded sequence slots
            lane = lax.broadcasted_iota(jnp.int32, (hp, lp), 1)
            lt = jnp.where(lane < l_true, lt, -jnp.inf)
        m = jnp.max(lt, axis=-1, keepdims=True)            # (Hp, 1)
        e = jnp.exp(lt - m)                                # (Hp, Lp)
        s = jnp.sum(e, axis=-1, keepdims=True)             # (Hp, 1)
        soft = e * pl.reciprocal(s, approx=False)          # exact: holds 1e-5
        o_ref[t] = soft.astype(o_ref.dtype)


def _step_bytes(tb, Lp, D, Hp, itemsize):
    x_blk = 2 * tb * Lp * D * itemsize        # input block, double-buffered
    o_blk = 2 * tb * Hp * Lp * itemsize       # output block, double-buffered
    resident = 2 * (Hp * D + Hp) * itemsize   # weight + bias (conservatively 2x)
    return x_blk + o_blk + resident


def _pick_batch_block(B, Lp, D, Hp, itemsize, budget_bytes=16 << 20):
    """Largest batch block that (a) keeps >= 2 grid steps when B >= 2 (feeds
    both v7x TensorCores) and (b) keeps the working set under budget_bytes."""
    max_tb = B if B < 2 else max(1, B // 2)
    for cand in range(max_tb, 0, -1):
        if B % cand == 0 and _step_bytes(cand, Lp, D, Hp, itemsize) <= budget_bytes:
            return cand
    return 1


def attention_forward(x, w, b, *, batch_block=None):
    """x: (B, L, D); w: (H, D) (nn.Linear layout); b: (H,). Returns (B, H, L)."""
    B, L, D = x.shape
    H = w.shape[0]

    # Head dim and sequence dim padded to the 8-sublane granule (padded
    # sequence slots are masked to -inf before the softmax; pads sliced off).
    Hp = ((H + 7) // 8) * 8
    Lp = ((L + 7) // 8) * 8
    if Hp != H:
        w = jnp.pad(w, ((0, Hp - H), (0, 0)))
        b = jnp.pad(b, ((0, Hp - H),))
    if Lp != L:
        x = jnp.pad(x, ((0, 0), (0, Lp - L), (0, 0)))
    b_row = b.reshape(1, Hp)

    itemsize = jnp.dtype(x.dtype).itemsize
    if batch_block is None:
        batch_block = _pick_batch_block(B, Lp, D, Hp, itemsize)
    elif B % batch_block != 0:
        batch_block = 1
    blk_bytes = _step_bytes(batch_block, Lp, D, Hp, itemsize)
    grid = (B // batch_block,)

    # Scoped-VMEM limit sized from the actual blocks (+ headroom), clamped so
    # it stays above every generation's default and below v7x's 64 MiB/TC.
    vmem_limit = int(min(48 << 20, max(32 << 20, 2 * blk_bytes)))

    kernel = functools.partial(attention_kernel, l_true=L)

    out = pl.pallas_call(
        kernel,
        out_shape=jax.ShapeDtypeStruct((B, Hp, Lp), x.dtype),
        grid_spec=pltpu.PrefetchScalarGridSpec(
            num_scalar_prefetch=0,
            grid=grid,
            in_specs=[
                pl.BlockSpec((batch_block, Lp, D), lambda i: (i, 0, 0)),  # x block
                pl.BlockSpec((Hp, D), lambda i: (0, 0)),                  # weight: resident
                pl.BlockSpec((1, Hp), lambda i: (0, 0)),                  # bias: resident
            ],
            out_specs=pl.BlockSpec((batch_block, Hp, Lp), lambda i: (i, 0, 0)),
        ),
        compiler_params=pltpu.CompilerParams(
            dimension_semantics=("parallel",),
            vmem_limit_bytes=vmem_limit,
        ),
    )(x, w, b_row)

    if Hp != H or Lp != L:
        out = out[:, :H, :L]
    return out


if __name__ == "__main__":
    # Small shapes consistent with the module: input_dim=32, n_heads=4,
    # batch=2, seq_len=16.
    B, L, D, H = 2, 16, 32, 4

    key = jax.random.PRNGKey(0)
    kx, kw, kb = jax.random.split(key, 3)

    x = jax.random.normal(kx, (B, L, D), dtype=jnp.float32)

    # Deterministic fc1 init (mimic nn.Linear uniform(-1/sqrt(D), 1/sqrt(D)))
    bound = 1.0 / (D ** 0.5)
    w = jax.random.uniform(kw, (H, D), minval=-bound, maxval=bound, dtype=jnp.float32)
    b = jax.random.uniform(kb, (H,), minval=-bound, maxval=bound, dtype=jnp.float32)

    out = attention_forward(x, w, b)
    out = jax.block_until_ready(out)

    # Pure-JAX reference of the PyTorch semantics.
    logits = jnp.einsum("bld,hd->blh", x, w) + b               # (B, L, H)
    ref = jax.nn.softmax(logits, axis=1).transpose(0, 2, 1)     # (B, H, L)
    assert out.shape == (B, H, L)
    assert jnp.allclose(out, ref, atol=1e-5, rtol=1e-5)

    print("KERNEL_OK")
</pallas_src>

<mosaic_0001>
module attributes {stable_mosaic.version = 11 : i64} {
  func.func @attention_kernel(%arg0: i32, %arg1: memref<1x16x32xf32, #tpu.memory_space<vmem>>, %arg2: memref<8x32xf32, #tpu.memory_space<vmem>>, %arg3: memref<1x8xf32, #tpu.memory_space<vmem>>, %arg4: memref<1x8x16xf32, #tpu.memory_space<vmem>>) attributes {dimension_semantics = [#tpu.dimension_semantics<parallel>], iteration_bounds = array<i64: 2>, scalar_prefetch = 0 : i64, scratch_operands = 0 : i64, tpu.core_type = #tpu.core_type<tc>, window_params = [{transform_indices = @transform_0, window_bounds = array<i64: 1, 16, 32>}, {pipeline_mode = #tpu.pipeline_mode<synchronous>, transform_indices = @transform_1, window_bounds = array<i64: 8, 32>}, {pipeline_mode = #tpu.pipeline_mode<synchronous>, transform_indices = @transform_2, window_bounds = array<i64: 1, 8>}, {transform_indices = @transform_3, window_bounds = array<i64: 1, 8, 16>}]} {
    %c0 = arith.constant 0 : index
    %c0_0 = arith.constant 0 : index
    %c0_1 = arith.constant 0 : index
    %0 = vector.load %arg1[%c0, %c0_0, %c0_1] : memref<1x16x32xf32, #tpu.memory_space<vmem>>, vector<1x16x32xf32>
    %1 = vector.shape_cast %0 : vector<1x16x32xf32> to vector<16x32xf32>
    %c0_2 = arith.constant 0 : index
    %c0_3 = arith.constant 0 : index
    %2 = vector.load %arg2[%c0_2, %c0_3] : memref<8x32xf32, #tpu.memory_space<vmem>>, vector<8x32xf32>
    %cst = arith.constant dense<0.000000e+00> : vector<16x8xf32>
    %3 = tpu.matmul %1, %2, %cst {dimension_numbers = #tpu.dot_dimension_numbers<[1], [1], [0], [0], [0, 0, 1, 0], [], []>} : vector<16x32xf32>, vector<8x32xf32>, vector<16x8xf32> -> vector<16x8xf32>
    %c0_4 = arith.constant 0 : index
    %c0_5 = arith.constant 0 : index
    %4 = vector.load %arg3[%c0_4, %c0_5] : memref<1x8xf32, #tpu.memory_space<vmem>>, vector<1x8xf32>
    %5 = vector.broadcast %4 : vector<1x8xf32> to vector<16x8xf32>
    %6 = arith.addf %3, %5 : vector<16x8xf32>
    %7 = vector.shape_cast %6 : vector<16x8xf32> to vector<1x16x8xf32>
    %8 = vector.shape_cast %7 : vector<1x16x8xf32> to vector<16x8xf32>
    %9 = tpu.transpose %8, [1, 0] : vector<16x8xf32> -> vector<8x16xf32>
    %cst_6 = arith.constant dense<0xFF800000> : vector<8xf32>
    %10 = vector.multi_reduction <maximumf>, %9, %cst_6 [1] : vector<8x16xf32> to vector<8xf32>
    %11 = vector.shape_cast %10 : vector<8xf32> to vector<8x1xf32>
    %12 = vector.broadcast %11 : vector<8x1xf32> to vector<8x16xf32>
    %13 = arith.subf %9, %12 : vector<8x16xf32>
    %14 = math.exp %13 : vector<8x16xf32>
    %cst_7 = arith.constant dense<0.000000e+00> : vector<8xf32>
    %15 = vector.multi_reduction <add>, %14, %cst_7 [1] : vector<8x16xf32> to vector<8xf32>
    %16 = vector.shape_cast %15 : vector<8xf32> to vector<8x1xf32>
    %17 = tpu.reciprocal %16 : vector<8x1xf32> -> vector<8x1xf32>
    %18 = vector.broadcast %17 : vector<8x1xf32> to vector<8x16xf32>
    %19 = arith.mulf %14, %18 : vector<8x16xf32>
    %c0_8 = arith.constant 0 : index
    %c0_9 = arith.constant 0 : index
    %c0_10 = arith.constant 0 : index
    %20 = vector.load %arg4[%c0_8, %c0_9, %c0_10] : memref<1x8x16xf32, #tpu.memory_space<vmem>>, vector<1x8x16xf32>
    %21 = vector.shape_cast %20 : vector<1x8x16xf32> to vector<8x16xf32>
    %22 = vector.shape_cast %19 : vector<8x16xf32> to vector<1x8x16xf32>
    tpu.vector_store %arg4[%c0_8, %c0_9, %c0_10], %22 {strides = array<i32>} : memref<1x8x16xf32, #tpu.memory_space<vmem>>, vector<1x8x16xf32>,
    return
  }
  func.func @transform_0(%arg0: i32) -> (i32, i32, i32) {
    %c0_i32 = arith.constant 0 : i32
    %c0_i32_0 = arith.constant 0 : i32
    %c0_i32_1 = arith.constant 0 : i32
    return %arg0, %c0_i32, %c0_i32_0 : i32, i32, i32
  }
  func.func @transform_1(%arg0: i32) -> (i32, i32) {
    %c0_i32 = arith.constant 0 : i32
    %c0_i32_0 = arith.constant 0 : i32
    %c0_i32_1 = arith.constant 0 : i32
    return %c0_i32, %c0_i32_0 : i32, i32
  }
  func.func @transform_2(%arg0: i32) -> (i32, i32) {
    %c0_i32 = arith.constant 0 : i32
    %c0_i32_0 = arith.constant 0 : i32
    %c0_i32_1 = arith.constant 0 : i32
    return %c0_i32, %c0_i32_0 : i32, i32
  }
  func.func @transform_3(%arg0: i32) -> (i32, i32, i32) {
    %c0_i32 = arith.constant 0 : i32
    %c0_i32_0 = arith.constant 0 : i32
    %c0_i32_1 = arith.constant 0 : i32
    return %arg0, %c0_i32, %c0_i32_0 : i32, i32, i32
  }
}

</mosaic_0001>

<bundles_post_ra>
// kernel: tpu_custom_call.1
= control target key start
LH: loop header
LB: loop body
LE: loop exit
PB: predicated region body
PF: predicated region fallthrough
CT: control target
= control target key end

     0   :  { %8 = vsyncpa [#allocation3], 0  ;;  %s886_s0 = inlined_call_operand.hbm [shape: f32[2,16,32], index: 0, kind: input, shape index: {}]   ;;  %s887_s1 = inlined_call_operand.hbm [shape: f32[8,32], index: 1, kind: input, shape index: {}]   ;;  %s888_s2 = inlined_call_operand.vmem [shape: f32[1,8], index: 2, kind: input, shape index: {}]   ;;  %s889_s3 = inlined_call_operand.hbm [shape: f32[2,8,16], index: 3, kind: output, shape index: {}]  }
   0x1   :  { %10 = vsyncpa [#allocation3 + $0x1], 0 }
   0x2   :  { %11 = vsyncpa [#allocation6], 0 }
   0x3   :  { %12 = vsyncpa [#allocation4], 0 }
   0x4   :  { %14 = vsyncpa [#allocation4 + $0x1], 0  ;;  %s683_s12 = smov 0   ;;  %s685_s13 = smov 0  }
   0x5   :  { %s687_s14 = smov 0   ;;  %s689_s15 = smov 0  }
   0x6 LB: > { %s704_s16 = sadd.s32 4294967295, %s656_s15   ;;  %s436_s17 = sadd.s32 4294967294, %s656_s15   ;;  %s656_s15 = sphi %s689_s15, %s914_s15   ;;  %s652_s14 = sphi %s687_s14, %s913_s14   ;;  %s648_s13 = sphi %s685_s13, %s912_s13   ;;  %s644_s12 = sphi %s683_s12, %s911_s12  }
   0x7   : > { %s708_s18 = sadd.s32 1, %s656_s15   ;;  %s27_s19 = sadd.s32 1, %s652_s14 }
   0x8   : > { %s24_s20 = ssub.s32 %s656_s15, %s708_s18  ;;  %p34_p0 = scmp.ne.s32.totalorder %s652_s14, %s648_s13 }
   0x9   : > { %p25_p1 = scmp.eq.s32.totalorder %s24_s20, 0  ;;  %p35_p2 = scmp.eq.s32.totalorder %s656_s15, 0 }
   0xa   : > { %p40_p3 = scmp.ne.s32.totalorder %s648_s13, %s644_s12  ;;  %p890_p4 = scmp.eq.s32.totalorder %s704_s16, 0 }
   0xb   : > { %s720_s21 = scalar_select %p25_p1, %s652_s14, %s27_s19  }
   0xc   : > { %p722_p5 = por %p35_p2, %p34_p0  ;;  %p728_p6 = por %p890_p4, %p40_p3 }
   0xd   : > { %p106_p7 = scmp.eq.s32.totalorder %s704_s16, 1  ;;  %p112_p8 = scmp.eq.s32.totalorder %s436_s17, 1 }
   0xe   : > { %s896_s23 = scalar_select %p728_p6, 1, 0 }
   0xf   : > { %p437_p9 = scmp.ge.s32.totalorder %s656_s15, 1  ;;  %p119_p10 = scmp.lt.s32.totalorder %s656_s15, 3 }
  0x10   : > { %p735_p11 = por %p106_p7, %p34_p0  ;;  %p739_p12 = por %p112_p8, %p40_p3 }
  0x11   : > { %p743_p13 = pnand %p437_p9, %p119_p10  ;;  %s658_s27 = smov [#allocation5]  }
  0x12   : > { %s897_s24 = scalar_select %p735_p11, 1, 0 }
  0x13   : > { %s898_s25 = scalar_select %p739_p12, 1, 0 }
  0x14   : > { %s899_s26 = scalar_select %p743_p13, 1, 0 }
  0x15   : > { %p472_p2 = pneg %p743_p13  ;;  %s132_s28 = sshll.u32 %s658_s27, 4  ;;  %s133_s28 = int_to_ptr.vmem [resolvable:$true] %s132_s28 }
  0x16   : > { %p485_p4 = scmp.lt.s32.totalorder %s656_s15, 2  ;;  %p900_p0 = scmp.eq.s32.totalorder %s704_s16, 0 }
  0x17   : > { %s146_s30 = sand.u32 1, %s652_s14   ;;  %s528_s8 = scalar_lea.hbm %s887_s1, 128 }
  0x18   : > { %p753_p7 = pnand %p472_p2, %p900_p0  ;;  %p760_p3 = pnand %p485_p4, %p722_p5 }
  0x19   : > { %s440_s5 = sshll.u32 %s146_s30, 4  ;;  %p529_p8 = scmp.ne.s32.totalorder %s887_s1, %s528_s8 }
  0x1a   : > { %s902_s4 = scalar_select %p760_p3, 1, 0 }
  0x1b   : > { %p530_p9 = pneg %p753_p7  ;;  %p535_p4 = scmp.lt.u32.totalorder %s528_s8, %s887_s1 }
  0x1d   : > { %p531_p10 = pnand %p530_p9, %p529_p8 }
  0x1f   : > { %p532_p2 = pneg %p531_p10 }
  0x21   : > { %p537_p5 = pnand %p535_p4, %p532_p2 }
  0x23   : > { %540 = shalt.err (!%p537_p5)
}
  0x24   : > { %s541_s19 = scalar_lea.vmem %s133_s28, 128  ;;  %p549_p11 = scmp.lt.s32.totalorder %s133_s28, %s133_s28 }
  0x25   : > { %p542_p0 = scmp.ne.s32.totalorder %s133_s28, %s541_s19  ;;  %p550_p6 = scmp.lt.s32.totalorder %s541_s19, %s541_s19 }
  0x27   : > { %p544_p1 = pnand %p542_p0, %p530_p9  ;;  %p551_p13 = por %p550_p6, %p549_p11 }
  0x29   : > { %p545_p12 = pneg %p544_p1 }
  0x2b   : > { %p552_p3 = pnand %p551_p13, %p545_p12 }
  0x2d   : > { %555 = shalt.err (!%p552_p3)
}
  0x2e   : > { %475 = dma.hbm_to_vmem [thread:$0]  (!%p753_p7), %s887_s1, 128, %s133_s28, [#allocation6]  }
  0x2f   : > { %s455_s27 = sshll.u32 %s656_s15, 8  ;;  %s150_s6 = scalar_lea.vmem [#allocation2], %s440_s5 }
  0x30   : > { %s157_s7 = sshll.u32 %s150_s6, 4  ;;  %s784_s10 = scalar_lea.hbm %s886_s0, %s455_s27  ;;  %s786_s7 = int_to_ptr.vmem [resolvable:$true] %s157_s7 }
  0x31   : > { %s788_s29 = scalar_lea.sflag [#allocation3], %s146_s30  ;;  %s556_s11 = scalar_lea.hbm %s784_s10, 256 }
  0x32   : > { %p557_p6 = scmp.ne.s32.totalorder %s784_s10, %s556_s11  ;;  %p903_p11 = scmp.ne.s32.totalorder %s902_s4, 0 }
  0x33   : > { %s561_s17 = scalar_lea.hbm %s886_s0, 512  ;;  %p562_p7 = scmp.lt.u32.totalorder %s784_s10, %s886_s0 }
  0x34   : > { %p558_p12 = pneg %p903_p11  ;;  %p563_p3 = scmp.lt.u32.totalorder %s561_s17, %s556_s11 }
  0x35   : > { %p565_p9 = scmp.lt.u32.totalorder %s556_s11, %s784_s10 }
  0x36   : > { %p559_p13 = pnand %p558_p12, %p557_p6  ;;  %p564_p8 = por %p563_p3, %p562_p7 }
  0x38   : > { %p560_p1 = pneg %p559_p13  ;;  %p566_p10 = por %p565_p9, %p564_p8 }
  0x3a   : > { %p567_p2 = pnand %p566_p10, %p560_p1 }
  0x3c   : > { %570 = shalt.err (!%p567_p2)
}
  0x3d   : > { %s571_s30 = scalar_lea.vmem %s786_s7, 256  ;;  %s659_s22 = smov [#allocation2]  }
  0x3e   : > { %p572_p4 = scmp.ne.s32.totalorder %s786_s7, %s571_s30  ;;  %s576_s27 = sshll.u32 %s659_s22, 4  ;;  %s577_s27 = int_to_ptr.vmem [resolvable:$false] %s576_s27 }
  0x3f   : > { %s578_s6 = scalar_lea.vmem %s577_s27, 512  ;;  %p579_p6 = scmp.lt.s32.totalorder %s786_s7, %s577_s27 }
  0x40   : > { %p574_p5 = pnand %p572_p4, %p558_p12  ;;  %p580_p13 = scmp.lt.s32.totalorder %s578_s6, %s571_s30 }
  0x42   : > { %p575_p0 = pneg %p574_p5  ;;  %p581_p7 = por %p580_p13, %p579_p6 }
  0x44   : > { %p582_p3 = pnand %p581_p7, %p575_p0 }
  0x46   : > { %585 = shalt.err (!%p582_p3)
}
  0x47   : > { %s660_s8 = smov 128   ;;  %s661_s9 = smov 8  }
  0x48   : > { %479 = dma.hbm_to_vmem [thread:$0]  (!%p903_p11), %s784_s10, 256, %s786_s7, %s788_s29, %s660_s8, %s660_s8, %s661_s9  }
  0x49   : > { %p904_p12 = scmp.ne.s32.totalorder %s899_s26, 0 }
  0x4a   : > { %s819_s11 = sand.u32 (!%p904_p12), 1, %s648_s13   ;;  %p905_p1 = scmp.ne.s32.totalorder (!%p904_p12), %s896_s23, 0 }
  0x4b   : > { %169 = sbr.rel (%p904_p12) target bundleno = 763 (0x2fb), region = 32  ;;  %s444_s28 = sshll.u32 (!%p904_p12), %s819_s11, 4 }
  0x4c   : > { %s172_s5 = scalar_lea.sflag (!%p904_p12), [#allocation3], %s819_s11  ;;  %s175_s17 = scalar_lea.vmem (!%p904_p12), [#allocation2], %s444_s28 }
  0x52   : > { %631 = dma.done.wait (%p905_p1), %s172_s5, 256  }
  0x53   : > { %633 = vsyncadd (%p905_p1), %s172_s5, 4294967040  ;;  %p906_p8 = scmp.eq.s32.totalorder %s704_s16, 0 }
  0x55   : > { %635 = dma.done.wait (%p906_p8), [#allocation6], 128   ;;  %p907_p11 = pmov %p906_p8 }
  0x56   : > { %vm212_vm0 = vcmask 261120   ;;  %v204_v0 = vld [vmem:[#allocation5] sm:$0xff]  ;;  %v203_v2 = vld [vmem:[%s175_s17 + $0x8] sm:$0xff]  ;;  %vm329_vm1 = vcmask 130048   ;;  %s446_s23 = sshll.u32 %s819_s11, 3  ;;  %s452_s7 = sshll.u32 %s704_s16, 7 }
  0x57   : > { %637 = vsyncadd (%p907_p11), [#allocation6], 4294967168  ;;  %v202_v1 = vld [vmem:[%s175_s17] sm:$0xff]  ;;  %459 = vmatprep.subr.msk.mxu0 %vm212_vm0, %v204_v0  ;;  %s201_s10 = scalar_lea.vmem [#allocation7], %s446_s23  ;;  %s841_s30 = scalar_lea.hbm %s889_s3, %s452_s7 }
  0x58   : > { %461 = vmatprep.mubr.msk.f32.mxu0 %vm212_vm0, %v202_v1  ;;  %460 = vmatpush3.xpose.msk.msra.mxu0 %vm212_vm0, %v204_v0  ;;  %v447_v3 = vld [vmem:[%s888_s2] ss:$0 sm:$0xff]  ;;  %s356_s29 = sshll.u32 %s201_s10, 4  ;;  %s343_s22 = scalar_lea.sflag [#allocation4], %s819_s11  ;;  %s843_s29 = int_to_ptr.vmem [resolvable:$true] %s356_s29 }
  0x59   : > { %s586_s27 = scalar_lea.vmem %s843_s29, 128  ;;  %p908_p10 = scmp.ne.s32.totalorder %s897_s24, 0 }
  0x5a   : > { %p587_p9 = scmp.ne.s32.totalorder %s843_s29, %s586_s27  ;;  %s662_s16 = smov [#allocation7]  }
  0x5b   : > { %462 = vmatmul.mubr.msk.f32.vlgmr.msra.gmra.mrb[0].mxu0 %vm212_vm0, %v203_v2  ;;  %s590_s6 = sshll.u32 %s662_s16, 4  ;;  %s591_s6 = int_to_ptr.vmem [resolvable:$false] %s590_s6 }
  0x5c   : > { %p588_p2 = pnand %p587_p9, %p908_p10  ;;  %s592_s8 = scalar_lea.vmem %s591_s6, 256 }
  0x5d   : > { %p593_p5 = scmp.lt.s32.totalorder %s843_s29, %s591_s6  ;;  %p594_p0 = scmp.lt.s32.totalorder %s592_s8, %s586_s27 }
  0x5e   : > { %p589_p4 = pneg %p588_p2 }
  0x5f   : > { %p595_p6 = por %p594_p0, %p593_p5 }
  0x61   : > { %p596_p13 = pnand %p595_p6, %p589_p4 }
 0x12e   : > { %v463_v4 = vpop.f32.mrb[0].mxu0 }
 0x12f   : > { %v288_v5 = vpop.f32.mrb[1].mxu0  ;;  %v294_v7 = vadd.f32 %v463_v4, %v447_v3 }
 0x130   : > { %v289_v6 = vadd.f32 %v447_v3, %v288_v5 }
 0x132   : > { %297 = vxpose.xlu0.b32.start [1/2] (short) (narrow) %v289_v6, 8 }
 0x136   : > { %298 = vxpose.xlu0.b32.end [2/2] (short) (narrow) %v294_v7, 8 }
 0x1b2   : > { %v313_v8 = vpop.trf.xlu0 }
 0x1b3   : > { %v330_v9 = vsel %vm329_vm1, %v313_v8, -inf }
 0x1b4   : > { %331 = vmax.xlane.f32.xlu1 %v330_v9 }
 0x241   : > { %v332_v10 = vpop.xlane.xlu1 %331 }
 0x242   : > { %v333_v11 = vsub.f32 %v313_v8, %v332_v10 }
 0x244   : > { %v334_v12 = vmul.f32 1.442695, %v333_v11 }
 0x246   : > { %524 = vpow2.f32 %v334_v12 }
 0x250   : > { %v525_v13 = vpop.eup %524 }
 0x251   : > { %v336_v14 = vsel %vm329_vm1, %v525_v13, 0.0 }
 0x252   : > { %337 = vadd.xlane.f32.xlu1 %v336_v14 }
 0x2df   : > { %v338_v15 = vpop.xlane.xlu1 %337 }
 0x2e0   : > { %526 = vrcp.f32 %v338_v15 }
 0x2ea   : > { %v527_v16 = vpop.eup %526 }
 0x2eb   : > { %v340_v17 = vmul.f32 %v527_v16, %v525_v13 }
 0x2ed   : > { %341 = vst.msk [vmem:[%s201_s10] sm:$0xff] %vm329_vm1, %v340_v17 }
 0x2ee   : > { %599 = shalt.err (!%p596_p13)
}
 0x2ef   : > { %s600_s9 = scalar_lea.hbm %s841_s30, 128  ;;  %s604_s5 = scalar_lea.hbm %s889_s3, 256 }
 0x2f0   : > { %p601_p7 = scmp.ne.s32.totalorder %s841_s30, %s600_s9  ;;  %p605_p1 = scmp.lt.u32.totalorder %s841_s30, %s889_s3 }
 0x2f1   : > { %p606_p8 = scmp.lt.u32.totalorder %s604_s5, %s600_s9  ;;  %p608_p9 = scmp.lt.u32.totalorder %s600_s9, %s841_s30 }
 0x2f2   : > { %p602_p3 = pnand %p601_p7, %p908_p10 }
 0x2f3   : > { %p607_p11 = por %p606_p8, %p605_p1 }
 0x2f4   : > { %p603_p12 = pneg %p602_p3 }
 0x2f5   : > { %p609_p2 = por %p608_p9, %p607_p11 }
 0x2f7   : > { %p610_p4 = pnand %p609_p2, %p603_p12 }
 0x2f9   : > { %613 = shalt.err (!%p610_p4)
}
 0x2fa   : > { %470 = dma.vmem_to_hbm [thread:$0]  (%p908_p10), %s843_s29, 128, %s841_s30, %s343_s22  }
 0x2fb PF: > { %s368_s4 = sand.u32 1, %s644_s12   ;;  %p909_p5 = scmp.ne.s32.totalorder %s898_s25, 0 }
 0x2fc   : > { %p910_p0 = scmp.ge.s32.totalorder %s656_s15, 2  ;;  %s369_s23 = scalar_lea.sflag [#allocation4], %s368_s4 }
 0x2fe   : > { %p481_p6 = pnand %p910_p0, %p909_p5 }
 0x300   : > { %639 = dma.done.wait (!%p481_p6), %s369_s23, 128  }
 0x301   : > { %641 = vsyncadd (!%p481_p6), %s369_s23, 4294967168  ;;  %p17_p13 = scmp.ge.s32.totalorder %s708_s18, 4   ;;  %s911_s12 = smov %s648_s13 }
 0x302   : > { %s912_s13 = smov %s652_s14  ;;  %s913_s14 = smov %s720_s21 }
 0x303   : > { %s914_s15 = smov %s708_s18  ;;  %19 = sbr.rel (!%p17_p13) target bundleno = 6 (0x6), region = 81 }
 0x30a   :  { %374 = vsyncpa [#allocation3], 1 }
 0x30b   :  { %376 = vsyncpa [#allocation3 + $0x1], 1 }
 0x30c   :  { %377 = vsyncpa [#allocation6], 1 }
 0x30d   :  { %378 = vsyncpa [#allocation4], 1 }
 0x30e   :  { %380 = vsyncpa [#allocation4 + $0x1], 1 }

</bundles_post_ra>
